<compile_context>
chip_gen: v5e
topology: v5e:2x2
jax: 0.10.0
libtpu: 0.0.40
codegen_flags: <defaults>
</compile_context>

<pallas_src>
import functools

import jax
import jax.numpy as jnp
from jax.experimental import pallas as pl
from jax.experimental.pallas import tpu as pltpu

EPS = 1e-5
_VMEM_LIMIT_BYTES = 48 * 1024 * 1024   # > default scoped VMEM, < v7x physical


def _lane_scale_shift(sum_lane, ssq_lane, g_r, b_r, g_i, b_i, inv_count, eps):
    """From per-lane partial sums (even lane = real, odd = imag), compute the
    (1,1,1,L2) lane vectors `scale`, `shift` so that out = x*scale + shift."""
    lane = jax.lax.broadcasted_iota(jnp.int32, sum_lane.shape, dimension=3)
    is_re = (lane & 1) == 0

    sum_all = jnp.sum(sum_lane, axis=3, keepdims=True)                 # (1,1,1,1)
    sum_r = jnp.sum(jnp.where(is_re, sum_lane, 0.0), axis=3, keepdims=True)
    sum_i = sum_all - sum_r
    ssq_all = jnp.sum(ssq_lane, axis=3, keepdims=True)
    ssq_r = jnp.sum(jnp.where(is_re, ssq_lane, 0.0), axis=3, keepdims=True)
    ssq_i = ssq_all - ssq_r

    mean_r = sum_r * inv_count
    mean_i = sum_i * inv_count
    # Biased variance (PyTorch forward); clamp >= 0 against roundoff.
    var_r = jnp.maximum(ssq_r * inv_count - mean_r * mean_r, 0.0)
    var_i = jnp.maximum(ssq_i * inv_count - mean_i * mean_i, 0.0)

    scale_r = jax.lax.rsqrt(var_r + eps) * g_r
    scale_i = jax.lax.rsqrt(var_i + eps) * g_i
    shift_r = b_r - mean_r * scale_r
    shift_i = b_i - mean_i * scale_i

    scale = jnp.where(is_re, scale_r, scale_i)                          # (1,1,1,L2)
    shift = jnp.where(is_re, shift_r, shift_i)
    return scale, shift


def _cbn_fused_kernel(gre_ref, bre_ref, gim_ref, bim_ref, x_ref, o_ref,
                      *, inv_count, eps):
    """Single-pass path: whole per-channel slab is resident (1R + 1W)."""
    c = pl.program_id(0)
    x = x_ref[...].astype(jnp.float32)                  # (N, 1, R, L2)
    sum_lane = jnp.sum(x, axis=(0, 1, 2), keepdims=True)        # (1,1,1,L2)
    ssq_lane = jnp.sum(x * x, axis=(0, 1, 2), keepdims=True)
    scale, shift = _lane_scale_shift(
        sum_lane, ssq_lane,
        gre_ref[c], bre_ref[c], gim_ref[c], bim_ref[c], inv_count, eps)
    o_ref[...] = (x * scale + shift).astype(o_ref.dtype)


def _cbn_tiled_kernel(gre_ref, bre_ref, gim_ref, bim_ref, x_ref, o_ref,
                      sum_ref, ssq_ref, *, inv_count, eps):
    """Tiled two-pass path: pass 0 accumulates per-lane partials, pass 1
    normalizes + writes (pass 1 walks tiles in reverse; see index maps)."""
    c = pl.program_id(0)
    p = pl.program_id(1)
    nt = pl.program_id(2)
    rt = pl.program_id(3)

    x = x_ref[...].astype(jnp.float32)                  # (TN, 1, TR, L2)

    @pl.when(p == 0)
    def _accumulate():
        @pl.when(jnp.logical_and(nt == 0, rt == 0))
        def _init():
            sum_ref[...] = jnp.zeros_like(sum_ref)
            ssq_ref[...] = jnp.zeros_like(ssq_ref)

        sum_ref[...] += jnp.sum(x, axis=(0, 1, 2), keepdims=True)
        ssq_ref[...] += jnp.sum(x * x, axis=(0, 1, 2), keepdims=True)

    @pl.when(p == 1)
    def _normalize():
        scale, shift = _lane_scale_shift(
            sum_ref[...], ssq_ref[...],
            gre_ref[c], bre_ref[c], gim_ref[c], bim_ref[c], inv_count, eps)
        o_ref[...] = (x * scale + shift).astype(o_ref.dtype)


def _pick_lane_width(total, max_l2=1024):
    """Largest even lane width dividing `total` (= H*W*2); prefer multiples of
    512/256/128 so vregs are fully utilized and stores are unmasked."""
    for base in (512, 256, 128):
        best = 0
        l = base
        while l <= max_l2:
            if total % l == 0:
                best = l
            l += base
        if best:
            return best
    best = 2
    l = 2
    while l <= min(total, max_l2):
        if total % l == 0:
            best = l
        l += 2
    return best


def _divisors_desc(n):
    return [d for d in range(n, 0, -1) if n % d == 0]


def _pick_tile(n, r, l2, itemsize, budget):
    """Pick (TN, TR): TR a multiple of 8 dividing R (or R itself), TN dividing
    N, maximizing block size subject to TN*TR*L2*itemsize <= budget."""
    if r % 8 == 0:
        row_opts = [d for d in _divisors_desc(r) if d % 8 == 0]
    else:
        row_opts = [r]
    n_opts = _divisors_desc(n)
    best = None
    for tr in row_opts:
        for tn in n_opts:
            if tn * tr * l2 * itemsize <= budget:
                cand = (tn * tr, tr, tn)
                if best is None or cand > best:
                    best = cand
    if best is None:
        return min(n_opts), min(row_opts)   # smallest legal block
    return best[2], best[1]


@functools.partial(
    jax.jit,
    static_argnames=("eps", "max_block_bytes", "single_pass_bytes", "lane_width"))
def complex_batch_norm_2d(x, gamma_re, beta_re, gamma_im, beta_im, *,
                          eps=EPS,
                          max_block_bytes=2 << 20,
                          single_pass_bytes=4 << 20,
                          lane_width=None):
    """x: (N, C, H, W, 2); params: (C,) each. Returns same shape/dtype as x."""
    N, C, H, W, two = x.shape
    assert two == 2

    total = H * W * 2
    L2 = lane_width if lane_width is not None else _pick_lane_width(total)
    assert total % L2 == 0 and L2 % 2 == 0, "lane width must be even & divide H*W*2"
    R = total // L2

    # Free views: collapse contiguous trailing dims into a lane-dense slab.
    xv = x.reshape(N, C, R, L2)
    gre = gamma_re.astype(jnp.float32)
    bre = beta_re.astype(jnp.float32)
    gim = gamma_im.astype(jnp.float32)
    bim = beta_im.astype(jnp.float32)

    inv_count = 1.0 / float(N * H * W)
    smem_spec = pl.BlockSpec(memory_space=pltpu.MemorySpace.SMEM)
    slab_bytes = N * R * L2 * 4   # per-channel slab as f32

    if slab_bytes <= single_pass_bytes:
        # ---------- single-pass fast path: 1 read + 1 write ----------
        kernel = functools.partial(
            _cbn_fused_kernel, inv_count=inv_count, eps=float(eps))
        block = (N, 1, R, L2)
        out = pl.pallas_call(
            kernel,
            out_shape=jax.ShapeDtypeStruct((N, C, R, L2), x.dtype),
            grid_spec=pltpu.PrefetchScalarGridSpec(
                num_scalar_prefetch=0,
                grid=(C,),
                in_specs=[smem_spec, smem_spec, smem_spec, smem_spec,
                          pl.BlockSpec(block, lambda c: (0, c, 0, 0))],
                out_specs=pl.BlockSpec(block, lambda c: (0, c, 0, 0)),
            ),
            compiler_params=pltpu.CompilerParams(
                dimension_semantics=("parallel",),
                vmem_limit_bytes=_VMEM_LIMIT_BYTES),
        )(gre, bre, gim, bim, xv)
        return out.reshape(N, C, H, W, 2)

    # ---------- tiled two-pass path ----------
    TN, TR = _pick_tile(N, R, L2, 4, max_block_bytes)
    NT, RT = N // TN, R // TR
    block = (TN, 1, TR, L2)

    def x_map(c, p, nt, rt):
        # p == 0: forward order; p == 1: reversed order (first normalize tile
        # reuses the input block left resident by the last stats tile).
        return (nt + p * (NT - 1 - 2 * nt), c, rt + p * (RT - 1 - 2 * rt), 0)

    def o_map(c, p, nt, rt):
        # During the stats pass, park the output block on the tile pass 1
        # writes first, so pass 0 triggers no spurious HBM writebacks.
        return ((NT - 1) - p * nt, c, (RT - 1) - p * rt, 0)

    kernel = functools.partial(
        _cbn_tiled_kernel, inv_count=inv_count, eps=float(eps))
    out = pl.pallas_call(
        kernel,
        out_shape=jax.ShapeDtypeStruct((N, C, R, L2), x.dtype),
        grid_spec=pltpu.PrefetchScalarGridSpec(
            num_scalar_prefetch=0,
            grid=(C, 2, NT, RT),
            in_specs=[smem_spec, smem_spec, smem_spec, smem_spec,
                      pl.BlockSpec(block, x_map)],
            out_specs=pl.BlockSpec(block, o_map),
            scratch_shapes=[pltpu.VMEM((1, 1, 1, L2), jnp.float32),
                            pltpu.VMEM((1, 1, 1, L2), jnp.float32)],
        ),
        compiler_params=pltpu.CompilerParams(
            dimension_semantics=("parallel", "arbitrary", "arbitrary", "arbitrary"),
            vmem_limit_bytes=_VMEM_LIMIT_BYTES),
    )(gre, bre, gim, bim, xv)
    return out.reshape(N, C, H, W, 2)


def _reference(x, gamma_re, beta_re, gamma_im, beta_im, eps=EPS):
    def bn(xc, g, b):  # xc: (N, C, H, W)
        mean = xc.mean(axis=(0, 2, 3), keepdims=True)
        var = xc.var(axis=(0, 2, 3), keepdims=True)  # biased, as PyTorch fwd
        return ((xc - mean) / jnp.sqrt(var + eps)
                * g[None, :, None, None] + b[None, :, None, None])

    real = bn(x[..., 0], gamma_re, beta_re)
    imag = bn(x[..., 1], gamma_im, beta_im)
    return jnp.stack([real, imag], axis=-1)


if __name__ == "__main__":
    N, C, H, W = 2, 4, 16, 16
    key = jax.random.PRNGKey(0)
    x = jax.random.normal(key, (N, C, H, W, 2), dtype=jnp.float32)

    # nn.BatchNorm2d init is weight=1, bias=0; use non-trivial deterministic
    # values so the affine path is exercised.
    gamma_re = 1.0 + 0.1 * jnp.arange(C, dtype=jnp.float32)
    beta_re = 0.01 * jnp.arange(C, dtype=jnp.float32)
    gamma_im = 1.0 - 0.05 * jnp.arange(C, dtype=jnp.float32)
    beta_im = -0.02 * jnp.arange(C, dtype=jnp.float32)

    ref = _reference(x, gamma_re, beta_re, gamma_im, beta_im)

    # Default: single-pass fast path (whole channel slab resident in VMEM).
    out = complex_batch_norm_2d(x, gamma_re, beta_re, gamma_im, beta_im)
    out = jax.block_until_ready(out)
    assert out.shape == (N, C, H, W, 2)
    assert jnp.allclose(out, ref, atol=1e-5, rtol=1e-5), "fast path mismatch"

    # Forced tiled two-pass path: exercises multi-tile accumulation, the
    # pass-1 reverse walk, and the output-block parking.
    out2 = complex_batch_norm_2d(x, gamma_re, beta_re, gamma_im, beta_im,
                                 single_pass_bytes=0, max_block_bytes=2048)
    out2 = jax.block_until_ready(out2)
    assert jnp.allclose(out2, ref, atol=1e-5, rtol=1e-5), "tiled path mismatch"

    print("KERNEL_OK")
</pallas_src>

<mosaic_0001>
module attributes {stable_mosaic.version = 11 : i64} {
  func.func @_cbn_fused_kernel(%arg0: i32, %arg1: memref<4xf32, #tpu.memory_space<smem>>, %arg2: memref<4xf32, #tpu.memory_space<smem>>, %arg3: memref<4xf32, #tpu.memory_space<smem>>, %arg4: memref<4xf32, #tpu.memory_space<smem>>, %arg5: memref<2x1x1x512xf32, #tpu.memory_space<vmem>>, %arg6: memref<2x1x1x512xf32, #tpu.memory_space<vmem>>) attributes {dimension_semantics = [#tpu.dimension_semantics<parallel>], iteration_bounds = array<i64: 4>, scalar_prefetch = 0 : i64, scratch_operands = 0 : i64, tpu.core_type = #tpu.core_type<tc>, window_params = [{transform_indices = @transform_0, window_bounds = array<i64: 4>}, {transform_indices = @transform_1, window_bounds = array<i64: 4>}, {transform_indices = @transform_2, window_bounds = array<i64: 4>}, {transform_indices = @transform_3, window_bounds = array<i64: 4>}, {transform_indices = @transform_4, window_bounds = array<i64: 2, 1, 1, 512>}, {transform_indices = @transform_5, window_bounds = array<i64: 2, 1, 1, 512>}]} {
    %c0 = arith.constant 0 : index
    %c0_0 = arith.constant 0 : index
    %c0_1 = arith.constant 0 : index
    %c0_2 = arith.constant 0 : index
    %0 = vector.load %arg5[%c0, %c0_0, %c0_1, %c0_2] : memref<2x1x1x512xf32, #tpu.memory_space<vmem>>, vector<2x1x1x512xf32>
    %cst = arith.constant dense<0.000000e+00> : vector<512xf32>
    %1 = vector.multi_reduction <add>, %0, %cst [0, 1, 2] : vector<2x1x1x512xf32> to vector<512xf32>
    %2 = vector.shape_cast %1 : vector<512xf32> to vector<1x1x1x512xf32>
    %3 = arith.mulf %0, %0 : vector<2x1x1x512xf32>
    %cst_3 = arith.constant dense<0.000000e+00> : vector<512xf32>
    %4 = vector.multi_reduction <add>, %3, %cst_3 [0, 1, 2] : vector<2x1x1x512xf32> to vector<512xf32>
    %5 = vector.shape_cast %4 : vector<512xf32> to vector<1x1x1x512xf32>
    %6 = arith.index_cast %arg0 : i32 to index
    %7 = memref.load %arg1[%6] : memref<4xf32, #tpu.memory_space<smem>>
    %8 = arith.index_cast %arg0 : i32 to index
    %9 = memref.load %arg2[%8] : memref<4xf32, #tpu.memory_space<smem>>
    %10 = arith.index_cast %arg0 : i32 to index
    %11 = memref.load %arg3[%10] : memref<4xf32, #tpu.memory_space<smem>>
    %12 = arith.index_cast %arg0 : i32 to index
    %13 = memref.load %arg4[%12] : memref<4xf32, #tpu.memory_space<smem>>
    %14 = tpu.iota {dimensions = array<i32: 3>} : vector<1x1x1x512xi32>
    %c1_i32 = arith.constant 1 : i32
    %15 = vector.broadcast %c1_i32 : i32 to vector<1x1x1x512xi32>
    %16 = arith.andi %14, %15 : vector<1x1x1x512xi32>
    %c0_i32 = arith.constant 0 : i32
    %17 = vector.broadcast %c0_i32 : i32 to vector<1x1x1x512xi32>
    %18 = arith.cmpi eq, %16, %17 : vector<1x1x1x512xi32>
    %cst_4 = arith.constant dense<0.000000e+00> : vector<1x1x1xf32>
    %19 = vector.multi_reduction <add>, %2, %cst_4 [3] : vector<1x1x1x512xf32> to vector<1x1x1xf32>
    %20 = vector.shape_cast %19 : vector<1x1x1xf32> to vector<1x1x1x1xf32>
    %cst_5 = arith.constant 0.000000e+00 : f32
    %21 = vector.broadcast %cst_5 : f32 to vector<1x1x1x512xf32>
    %22 = arith.select %18, %2, %21 : vector<1x1x1x512xi1>, vector<1x1x1x512xf32>
    %cst_6 = arith.constant dense<0.000000e+00> : vector<1x1x1xf32>
    %23 = vector.multi_reduction <add>, %22, %cst_6 [3] : vector<1x1x1x512xf32> to vector<1x1x1xf32>
    %24 = vector.shape_cast %23 : vector<1x1x1xf32> to vector<1x1x1x1xf32>
    %25 = arith.subf %20, %24 : vector<1x1x1x1xf32>
    %cst_7 = arith.constant dense<0.000000e+00> : vector<1x1x1xf32>
    %26 = vector.multi_reduction <add>, %5, %cst_7 [3] : vector<1x1x1x512xf32> to vector<1x1x1xf32>
    %27 = vector.shape_cast %26 : vector<1x1x1xf32> to vector<1x1x1x1xf32>
    %cst_8 = arith.constant 0.000000e+00 : f32
    %28 = vector.broadcast %cst_8 : f32 to vector<1x1x1x512xf32>
    %29 = arith.select %18, %5, %28 : vector<1x1x1x512xi1>, vector<1x1x1x512xf32>
    %cst_9 = arith.constant dense<0.000000e+00> : vector<1x1x1xf32>
    %30 = vector.multi_reduction <add>, %29, %cst_9 [3] : vector<1x1x1x512xf32> to vector<1x1x1xf32>
    %31 = vector.shape_cast %30 : vector<1x1x1xf32> to vector<1x1x1x1xf32>
    %32 = arith.subf %27, %31 : vector<1x1x1x1xf32>
    %cst_10 = arith.constant 0.001953125 : f32
    %33 = vector.broadcast %cst_10 : f32 to vector<1x1x1x1xf32>
    %34 = arith.mulf %24, %33 : vector<1x1x1x1xf32>
    %cst_11 = arith.constant 0.001953125 : f32
    %35 = vector.broadcast %cst_11 : f32 to vector<1x1x1x1xf32>
    %36 = arith.mulf %25, %35 : vector<1x1x1x1xf32>
    %cst_12 = arith.constant 0.001953125 : f32
    %37 = vector.broadcast %cst_12 : f32 to vector<1x1x1x1xf32>
    %38 = arith.mulf %31, %37 : vector<1x1x1x1xf32>
    %39 = arith.mulf %34, %34 : vector<1x1x1x1xf32>
    %40 = arith.subf %38, %39 : vector<1x1x1x1xf32>
    %cst_13 = arith.constant 0.000000e+00 : f32
    %41 = vector.broadcast %cst_13 : f32 to vector<1x1x1x1xf32>
    %42 = arith.maximumf %40, %41 : vector<1x1x1x1xf32>
    %cst_14 = arith.constant 0.001953125 : f32
    %43 = vector.broadcast %cst_14 : f32 to vector<1x1x1x1xf32>
    %44 = arith.mulf %32, %43 : vector<1x1x1x1xf32>
    %45 = arith.mulf %36, %36 : vector<1x1x1x1xf32>
    %46 = arith.subf %44, %45 : vector<1x1x1x1xf32>
    %cst_15 = arith.constant 0.000000e+00 : f32
    %47 = vector.broadcast %cst_15 : f32 to vector<1x1x1x1xf32>
    %48 = arith.maximumf %46, %47 : vector<1x1x1x1xf32>
    %cst_16 = arith.constant 9.99999974E-6 : f32
    %49 = vector.broadcast %cst_16 : f32 to vector<1x1x1x1xf32>
    %50 = arith.addf %42, %49 : vector<1x1x1x1xf32>
    %51 = math.rsqrt %50 : vector<1x1x1x1xf32>
    %52 = vector.broadcast %7 : f32 to vector<1x1x1x1xf32>
    %53 = arith.mulf %51, %52 : vector<1x1x1x1xf32>
    %cst_17 = arith.constant 9.99999974E-6 : f32
    %54 = vector.broadcast %cst_17 : f32 to vector<1x1x1x1xf32>
    %55 = arith.addf %48, %54 : vector<1x1x1x1xf32>
    %56 = math.rsqrt %55 : vector<1x1x1x1xf32>
    %57 = vector.broadcast %11 : f32 to vector<1x1x1x1xf32>
    %58 = arith.mulf %56, %57 : vector<1x1x1x1xf32>
    %59 = arith.mulf %34, %53 : vector<1x1x1x1xf32>
    %60 = vector.broadcast %9 : f32 to vector<1x1x1x1xf32>
    %61 = arith.subf %60, %59 : vector<1x1x1x1xf32>
    %62 = arith.mulf %36, %58 : vector<1x1x1x1xf32>
    %63 = vector.broadcast %13 : f32 to vector<1x1x1x1xf32>
    %64 = arith.subf %63, %62 : vector<1x1x1x1xf32>
    %65 = vector.shape_cast %53 : vector<1x1x1x1xf32> to vector<1x1x1x1xf32>
    %66 = vector.broadcast %65 : vector<1x1x1x1xf32> to vector<1x1x1x512xf32>
    %67 = vector.shape_cast %58 : vector<1x1x1x1xf32> to vector<1x1x1x1xf32>
    %68 = vector.broadcast %67 : vector<1x1x1x1xf32> to vector<1x1x1x512xf32>
    %69 = arith.select %18, %66, %68 : vector<1x1x1x512xi1>, vector<1x1x1x512xf32>
    %70 = vector.shape_cast %61 : vector<1x1x1x1xf32> to vector<1x1x1x1xf32>
    %71 = vector.broadcast %70 : vector<1x1x1x1xf32> to vector<1x1x1x512xf32>
    %72 = vector.shape_cast %64 : vector<1x1x1x1xf32> to vector<1x1x1x1xf32>
    %73 = vector.broadcast %72 : vector<1x1x1x1xf32> to vector<1x1x1x512xf32>
    %74 = arith.select %18, %71, %73 : vector<1x1x1x512xi1>, vector<1x1x1x512xf32>
    %75 = vector.broadcast %69 : vector<1x1x1x512xf32> to vector<2x1x1x512xf32>
    %76 = arith.mulf %0, %75 : vector<2x1x1x512xf32>
    %77 = vector.broadcast %74 : vector<1x1x1x512xf32> to vector<2x1x1x512xf32>
    %78 = arith.addf %76, %77 : vector<2x1x1x512xf32>
    %c0_18 = arith.constant 0 : index
    %c0_19 = arith.constant 0 : index
    %c0_20 = arith.constant 0 : index
    %c0_21 = arith.constant 0 : index
    %79 = vector.load %arg6[%c0_18, %c0_19, %c0_20, %c0_21] : memref<2x1x1x512xf32, #tpu.memory_space<vmem>>, vector<2x1x1x512xf32>
    tpu.vector_store %arg6[%c0_18, %c0_19, %c0_20, %c0_21], %78 {strides = array<i32>} : memref<2x1x1x512xf32, #tpu.memory_space<vmem>>, vector<2x1x1x512xf32>,
    return
  }
  func.func @transform_0(%arg0: i32) -> i32 {
    %c0_i32 = arith.constant 0 : i32
    %c0_i32_0 = arith.constant 0 : i32
    return %c0_i32 : i32
  }
  func.func @transform_1(%arg0: i32) -> i32 {
    %c0_i32 = arith.constant 0 : i32
    %c0_i32_0 = arith.constant 0 : i32
    return %c0_i32 : i32
  }
  func.func @transform_2(%arg0: i32) -> i32 {
    %c0_i32 = arith.constant 0 : i32
    %c0_i32_0 = arith.constant 0 : i32
    return %c0_i32 : i32
  }
  func.func @transform_3(%arg0: i32) -> i32 {
    %c0_i32 = arith.constant 0 : i32
    %c0_i32_0 = arith.constant 0 : i32
    return %c0_i32 : i32
  }
  func.func @transform_4(%arg0: i32) -> (i32, i32, i32, i32) {
    %c0_i32 = arith.constant 0 : i32
    %c0_i32_0 = arith.constant 0 : i32
    %c0_i32_1 = arith.constant 0 : i32
    %c0_i32_2 = arith.constant 0 : i32
    return %c0_i32, %arg0, %c0_i32_0, %c0_i32_1 : i32, i32, i32, i32
  }
  func.func @transform_5(%arg0: i32) -> (i32, i32, i32, i32) {
    %c0_i32 = arith.constant 0 : i32
    %c0_i32_0 = arith.constant 0 : i32
    %c0_i32_1 = arith.constant 0 : i32
    %c0_i32_2 = arith.constant 0 : i32
    return %c0_i32, %arg0, %c0_i32_0, %c0_i32_1 : i32, i32, i32, i32
  }
}

</mosaic_0001>

<bundles_post_ra>
// kernel: complex_batch_norm_2d.1
= control target key start
LH: loop header
LB: loop body
LE: loop exit
PB: predicated region body
PF: predicated region fallthrough
CT: control target
= control target key end

     0   :  { %10 = vsyncpa [#allocation3], 0  ;;  %s1138_s0 = inlined_call_operand.vmem [shape: f32[4], index: 0, kind: input, shape index: {}]   ;;  %s1139_s1 = inlined_call_operand.vmem [shape: f32[4], index: 1, kind: input, shape index: {}]   ;;  %s1140_s2 = inlined_call_operand.vmem [shape: f32[4], index: 2, kind: input, shape index: {}]   ;;  %s1141_s3 = inlined_call_operand.vmem [shape: f32[4], index: 3, kind: input, shape index: {}]   ;;  %s1142_s4 = inlined_call_operand.vmem [shape: f32[2,4,1,512], index: 4, kind: input, shape index: {}]   ;;  %s1143_s5 = inlined_call_operand.vmem [shape: f32[2,4,1,512], index: 5, kind: output, shape index: {}]  }
   0x1   :  { %11 = vsyncpa [#allocation5], 0 }
   0x2   :  { %12 = vsyncpa [#allocation8], 0  ;;  %s933_s18 = smov 0   ;;  %s935_s19 = smov 0  }
   0x3   :  { %s937_s20 = smov 0  }
   0x4 LB: > { %s949_s21 = sadd.s32 4294967295, %s897_s20   ;;  %s952_s22 = sadd.s32 1, %s897_s20   ;;  %s897_s20 = sphi %s937_s20, %s1157_s20   ;;  %s893_s19 = sphi %s935_s19, %s1156_s19   ;;  %s889_s18 = sphi %s933_s18, %s1155_s18  }
   0x5   : > { %s106_s23 = ssub.s32 %s897_s20, %s952_s22  ;;  %s109_s24 = sadd.s32 1, %s893_s19 }
   0x6   : > { %p107_p0 = scmp.eq.s32.totalorder %s106_s23, 0  ;;  %p116_p1 = scmp.ne.s32.totalorder %s893_s19, %s889_s18 }
   0x7   : > { %p117_p2 = scmp.eq.s32.totalorder %s897_s20, 0  ;;  %p146_p3 = scmp.eq.s32.totalorder %s949_s21, 3 }
   0x8   : > { %s962_s25 = scalar_select %p107_p0, %s893_s19, %s109_s24  }
   0x9   : > { %p964_p4 = por %p117_p2, %p116_p1  ;;  %p968_p5 = por %p146_p3, %p116_p1 }
   0xa   : > { %p715_p6 = scmp.ge.s32.totalorder %s897_s20, 1  ;;  %p159_p7 = scmp.lt.s32.totalorder %s897_s20, 5 }
   0xb   : > { %p763_p8 = scmp.eq.s32.totalorder %s949_s21, 0  ;;  %s181_s6 = sshll.u32 %s1139_s1, 4  ;;  %s182_s6 = int_to_ptr.vmem [resolvable:$true] %s181_s6 }
   0xc   : > { %p975_p9 = pnand %p715_p6, %p159_p7  ;;  %s171_s9 = sshll.u32 %s1138_s0, 4  ;;  %s172_s9 = int_to_ptr.vmem [resolvable:$true] %s171_s9 }
   0xd   : > { %s191_s12 = sshll.u32 %s1140_s2, 4  ;;  %s201_s15 = sshll.u32 %s1141_s3, 4  ;;  %s192_s12 = int_to_ptr.vmem [resolvable:$true] %s191_s12  ;;  %s202_s15 = int_to_ptr.vmem [resolvable:$true] %s201_s15 }
   0xe   : > { %p750_p10 = pneg %p975_p9  ;;  %s899_s16 = smov [#allocation4]  }
   0xf   : > { %s900_s17 = smov [#allocation2]   ;;  %s901_s23 = smov [#allocation6]  }
  0x10   : > { %p751_p11 = pnand %p763_p8, %p750_p10  ;;  %s902_s24 = smov [#allocation7]  }
  0x11   : > { %p720_p12 = scmp.ge.s32.totalorder %s897_s20, 4 }
  0x12   : > { %756 = dma.vmem_to_smem (!%p751_p11), %s182_s6, 16, %s899_s16, [#allocation5]  }
  0x13   : > { %753 = dma.vmem_to_smem (!%p751_p11), %s172_s9, 16, %s900_s17, [#allocation3]  }
  0x14   : > { %759 = dma.vmem_to_smem (!%p751_p11), %s192_s12, 16, %s901_s23, [#allocation5]  }
  0x15   : > { %762 = dma.vmem_to_smem (!%p751_p11), %s202_s15, 16, %s902_s24, [#allocation8]  }
  0x16   : > { %208 = sbr.rel (%p720_p12) target bundleno = 33 (0x21), region = 32 }
  0x1b   : > { %211 = sbr.rel (!%p964_p4) target bundleno = 33 (0x21), region = 36  ;;  %s213_s29 = sand.u32 (%p964_p4), 1, %s893_s19  }
  0x1c   : > { %s722_s30 = sshll.u32 (%p964_p4), %s897_s20, 2  ;;  %s721_s7 = sshll.u32 (%p964_p4), %s213_s29, 3 }
  0x1d   : > { %s217_s9 = scalar_lea.vmem (%p964_p4), %s1142_s4, %s722_s30  ;;  %s215_s10 = scalar_lea.vmem (%p964_p4), [#allocation9], %s721_s7 }
  0x1e   : > { %v234_v0 = vld [vmem:[%s217_s9] sm:$0xf] (%p964_p4)  ;;  %v236_v1 = vld [vmem:[%s217_s9 + $0x10] sm:$0xf] (%p964_p4) }
  0x1f   : > { %235 = vst [vmem:[%s215_s10] sm:$0xf] (%p964_p4), %v234_v0 }
  0x20   : > { %237 = vst [vmem:[%s215_s10 + $0x4] sm:$0xf] %v236_v1 }
  0x21 PF: > { %268 = sbr.rel (%p975_p9) target bundleno = 257 (0x101), region = 77 }
  0x26   : > { %876 = dma.done.wait (%p763_p8), [#allocation3], 16  }
  0x27   : > { %878 = vsyncadd (%p763_p8), [#allocation3], 4294967280 }
  0x28   : > { %880 = dma.done.wait (%p763_p8), [#allocation5], 32  }
  0x29   : > { %882 = vsyncadd (%p763_p8), [#allocation5], 4294967264 }
  0x2a   : > { %884 = dma.done.wait (%p763_p8), [#allocation8], 16  }
  0x2b   : > { %886 = vsyncadd (%p763_p8), [#allocation8], 4294967280  ;;  %s291_s20 = sand.u32 1, %s889_s18  }
  0x2c   : > { %s1018_s26 = sshll.u32 %s291_s20, 3 }
  0x2d   : > { %s293_s28 = scalar_lea.vmem [#allocation9], %s1018_s26 }
  0x2e   : > { %297 = sfence }
  0x2f   : > { %v1021_v2 = vld [vmem:[%s293_s28] sm:$0xf]  ;;  %v1023_v3 = vld [vmem:[%s293_s28 + $0x4] sm:$0xf]  ;;  %vm338_vm0 = vcmask 1040384   ;;  %v435_v4 = vlaneseq  ;;  %s431_s18 = sld [smem:[#allocation2 + %s949_s21]] }
  0x30   : > { %v322_v5 = vperm.slane %v1021_v2, 0  ;;  %v323_v6 = vperm.slane %v1021_v2, 1  ;;  %v324_v7 = vperm.slane %v1021_v2, 2  ;;  %v325_v8 = vperm.slane %v1021_v2, 3  ;;  %s433_s11 = sld [smem:[#allocation6 + %s949_s21]]  ;;  %s317_s14 = scalar_lea.vmem [#allocation10], %s1018_s26 }
  0x31   : > { %v326_v9 = vperm.slane %v1023_v3, 0  ;;  %v327_v10 = vperm.slane %v1023_v3, 1  ;;  %v328_v11 = vperm.slane %v1023_v3, 2  ;;  %v329_v12 = vperm.slane %v1023_v3, 3  ;;  %s432_s12 = sld [smem:[#allocation4 + %s949_s21]]  ;;  %s731_s15 = sshll.u32 (%p968_p5), %s949_s21, 2 }
  0x32   : > { %v339_v13 = vsel %vm338_vm0, %v322_v5, 0.0  ;;  %v348_v14 = vsel %vm338_vm0, %v323_v6, 0.0  ;;  %v357_v15 = vsel %vm338_vm0, %v324_v7, 0.0  ;;  %v366_v16 = vsel %vm338_vm0, %v325_v8, 0.0  ;;  %s434_s13 = sld [smem:[#allocation7 + %s949_s21]]  ;;  %s570_s23 = scalar_lea.vmem (%p968_p5), %s1143_s5, %s731_s15 }
  0x33   : > { %v340_v17 = vsel %vm338_vm0, %v326_v9, 0.0  ;;  %v349_v18 = vsel %vm338_vm0, %v327_v10, 0.0  ;;  %v358_v19 = vsel %vm338_vm0, %v328_v11, 0.0  ;;  %v367_v20 = vsel %vm338_vm0, %v329_v12, 0.0 }
  0x34   : > { %v341_v21 = vadd.f32 %v340_v17, %v339_v13  ;;  %v350_v22 = vadd.f32 %v349_v18, %v348_v14  ;;  %v359_v23 = vadd.f32 %v358_v19, %v357_v15  ;;  %v368_v24 = vadd.f32 %v367_v20, %v366_v16 }
  0x35   : > { %v375_v25 = vmul.f32 %v1021_v2, %v1021_v2  ;;  %v376_v26 = vmul.f32 %v1023_v3, %v1023_v3  ;;  %v1046_v27 = vand.u32 127, %v435_v4  ;;  %vm536_vm11 = vcmask 1042434  }
  0x36   : > { %v342_v28 = vrot.slane %v341_v21, 4  ;;  %v351_v29 = vrot.slane %v350_v22, 4  ;;  %v360_v30 = vrot.slane %v359_v23, 4  ;;  %v369_v31 = vrot.slane %v368_v24, 4 }
  0x37   : > { %v379_v32 = vperm.slane %v375_v25, 0  ;;  %v380_v33 = vperm.slane %v375_v25, 1  ;;  %v381_v34 = vperm.slane %v375_v25, 2  ;;  %v382_v35 = vperm.slane %v375_v25, 3 }
  0x38   : > { %v343_v36 = vadd.f32 %v342_v28, %v341_v21  ;;  %v352_v37 = vadd.f32 %v351_v29, %v350_v22  ;;  %v361_v38 = vadd.f32 %v360_v30, %v359_v23  ;;  %v370_v39 = vadd.f32 %v369_v31, %v368_v24 }
  0x39   : > { %v383_v40 = vperm.slane %v376_v26, 0  ;;  %v384_v41 = vperm.slane %v376_v26, 1  ;;  %v385_v42 = vperm.slane %v376_v26, 2  ;;  %v386_v43 = vperm.slane %v376_v26, 3 }
  0x3a   : > { %v344_v44 = vrot.slane %v343_v36, 2  ;;  %v353_v45 = vrot.slane %v352_v37, 2  ;;  %v362_v46 = vrot.slane %v361_v38, 2  ;;  %v371_v47 = vrot.slane %v370_v39, 2 }
  0x3b   : > { %v395_v48 = vsel %vm338_vm0, %v379_v32, 0.0  ;;  %v396_v49 = vsel %vm338_vm0, %v383_v40, 0.0  ;;  %v404_v50 = vsel %vm338_vm0, %v380_v33, 0.0  ;;  %v405_v51 = vsel %vm338_vm0, %v384_v41, 0.0 }
  0x3c   : > { %v345_v52 = vadd.f32 %v344_v44, %v343_v36  ;;  %v354_v53 = vadd.f32 %v353_v45, %v352_v37  ;;  %v363_v54 = vadd.f32 %v362_v46, %v361_v38  ;;  %v372_v55 = vadd.f32 %v371_v47, %v370_v39 }
  0x3d   : > { %v397_v56 = vadd.f32 %v396_v49, %v395_v48  ;;  %v406_v57 = vadd.f32 %v405_v51, %v404_v50  ;;  %v413_v58 = vsel %vm338_vm0, %v381_v34, 0.0  ;;  %v414_v59 = vsel %vm338_vm0, %v385_v42, 0.0 }
  0x3e   : > { %v346_v60 = vrot.slane %v345_v52, 1  ;;  %v355_v61 = vrot.slane %v354_v53, 1  ;;  %v364_v62 = vrot.slane %v363_v54, 1  ;;  %v373_v63 = vrot.slane %v372_v55, 1 }
  0x3f   : > { %v398_v0 = vrot.slane %v397_v56, 4  ;;  %v407_v1 = vrot.slane %v406_v57, 4  ;;  %v415_v5 = vadd.f32 %v414_v59, %v413_v58  ;;  %v422_v6 = vsel %vm338_vm0, %v382_v35, 0.0 }
  0x40   : > { %v347_v7 = vadd.f32 %v346_v60, %v345_v52  ;;  %v356_v8 = vadd.f32 %v355_v61, %v354_v53  ;;  %v365_v9 = vadd.f32 %v364_v62, %v363_v54  ;;  %v374_v10 = vadd.f32 %v373_v63, %v372_v55 }
  0x41   : > { %v399_v11 = vadd.f32 %v398_v0, %v397_v56  ;;  %v408_v12 = vadd.f32 %v407_v1, %v406_v57  ;;  %v416_v13 = vrot.slane %v415_v5, 4  ;;  %v423_v14 = vsel %vm338_vm0, %v386_v43, 0.0 }
  0x42   : > { %v448_v15 = vadd.f32 %v356_v8, %v347_v7  ;;  %v424_v16 = vadd.f32 %v423_v14, %v422_v6  ;;  %v437_v17 = vadd.s32 128, %v1046_v27  ;;  %v438_v18 = vadd.s32 256, %v1046_v27 }
  0x43   : > { %v400_v19 = vrot.slane %v399_v11, 2  ;;  %v409_v20 = vrot.slane %v408_v12, 2  ;;  %v417_v21 = vadd.f32 %v416_v13, %v415_v5  ;;  %v439_v22 = vadd.s32 384, %v1046_v27 }
  0x44   : > { %v449_v23 = vadd.f32 %v448_v15, %v365_v9  ;;  %v425_v24 = vrot.slane %v424_v16, 4  ;;  %v440_v25 = vand.u32 1, %v1046_v27  ;;  %v441_v26 = vand.u32 1, %v437_v17 }
  0x45   : > { %v401_v28 = vadd.f32 %v400_v19, %v399_v11  ;;  %v410_v29 = vadd.f32 %v409_v20, %v408_v12  ;;  %v418_v30 = vrot.slane %v417_v21, 2  ;;  %v442_v31 = vand.u32 1, %v438_v18 }
  0x46   : > { %v450_v32 = vadd.f32 %v449_v23, %v374_v10  ;;  %v426_v33 = vadd.f32 %v425_v24, %v424_v16  ;;  %v443_v34 = vand.u32 1, %v439_v22  ;;  %vm1060_vm1 = vcmp.eq.s32.totalorder %v440_v25, 0 }
  0x47   : > { %v402_v36 = vrot.slane %v401_v28, 1  ;;  %v411_v37 = vrot.slane %v410_v29, 1  ;;  %v419_v38 = vadd.f32 %v418_v30, %v417_v21  ;;  %vm1064_vm2 = vcmp.eq.s32.totalorder %v441_v26, 0 }
  0x48   : > { %451 = vadd.xlane.f32.xlu0 %v450_v32  ;;  %v427_v27 = vrot.slane %v426_v33, 2  ;;  %vm1068_vm3 = vcmp.eq.s32.totalorder %v442_v31, 0  ;;  %vm1072_vm4 = vcmp.eq.s32.totalorder %v443_v34, 0  ;;  %v453_v42 = vsel %vm1060_vm1, %v347_v7, 0.0 }
  0x49   : > { %v403_v43 = vadd.f32 %v402_v36, %v401_v28  ;;  %v412_v44 = vadd.f32 %v411_v37, %v410_v29  ;;  %v420_v45 = vrot.slane %v419_v38, 1  ;;  %v454_v46 = vsel %vm1064_vm2, %v356_v8, 0.0 }
  0x4a   : > { %v428_v47 = vadd.f32 %v427_v27, %v426_v33  ;;  %v455_v48 = vsel %vm1068_vm3, %v365_v9, 0.0  ;;  %v456_v49 = vsel %vm1072_vm4, %v374_v10, 0.0  ;;  %v457_v50 = vadd.f32 %v454_v46, %v453_v42 }
  0x4b   : > { %v421_v51 = vadd.f32 %v420_v45, %v419_v38  ;;  %v463_v52 = vadd.f32 %v412_v44, %v403_v43  ;;  %v468_v53 = vsel %vm1060_vm1, %v403_v43, 0.0  ;;  %v469_v54 = vsel %vm1064_vm2, %v412_v44, 0.0 }
  0x4c   : > { %v429_v55 = vrot.slane %v428_v47, 1  ;;  %v458_v56 = vadd.f32 %v457_v50, %v455_v48  ;;  %v472_v60 = vadd.f32 %v469_v54, %v468_v53  ;;  %v499_v33 = vstv %s431_s18 }
  0x4d   : > { %v464_v57 = vadd.f32 %v463_v52, %v421_v51  ;;  %v470_v61 = vsel %vm1068_vm3, %v421_v51, 0.0  ;;  %v512_v37 = vstv %s433_s11  ;;  %v515_v44 = vstv %s432_s12 }
  0x4e   : > { %v430_v58 = vadd.f32 %v429_v55, %v428_v47  ;;  %v459_v59 = vadd.f32 %v458_v56, %v456_v49  ;;  %v473_v63 = vadd.f32 %v472_v60, %v470_v61  ;;  %v518_v47 = vstv %s434_s13 }
  0x4f   : > { %vm538_vm12 = vcmask 1041408   ;;  %vm558_vm13 = vcmp.lt.s32.totalorder %v435_v4, 512 }
  0x50   : > { %v465_v62 = vadd.f32 %v464_v57, %v430_v58  ;;  %460 = vadd.xlane.f32.xlu0 %v459_v59  ;;  %v471_v0 = vsel %vm1072_vm4, %v430_v58, 0.0 }
  0x51   : > { %v474_v1 = vadd.f32 %v473_v63, %v471_v0 }
  0x52   : > { %466 = vadd.xlane.f32.xlu1 %v465_v62 }
  0x5a   : > { %475 = vadd.xlane.f32.xlu1 %v474_v1 }
  0xbb   : > { %v452_v5 = vpop.xlane.xlu0 %451 }
  0xc3   : > { %v461_v6 = vpop.xlane.xlu0 %460 }
  0xc4   : > { %v462_v8 = vsub.f32 %v452_v5, %v461_v6  ;;  %v478_v9 = vmul.f32 0.001953125, %v461_v6 }
  0xc5   : > { %v467_v7 = vpop.xlane.xlu1 %466 }
  0xc6   : > { %v479_v10 = vmul.f32 0.001953125, %v462_v8  ;;  %v481_v11 = vmul.f32 %v478_v9, %v478_v9 }
  0xc8   : > { %v485_v13 = vmul.f32 %v479_v10, %v479_v10 }
  0xcd   : > { %v476_v12 = vpop.xlane.xlu1 %475 }
  0xce   : > { %v477_v14 = vsub.f32 %v467_v7, %v476_v12  ;;  %v480_v15 = vmul.f32 0.001953125, %v476_v12 }
  0xd0   : > { %v482_v16 = vsub.f32 %v480_v15, %v481_v11  ;;  %v484_v17 = vmul.f32 0.001953125, %v477_v14 }
  0xd2   : > { %v483_v18 = vmax.f32 %v482_v16, 0.0  ;;  %v486_v19 = vsub.f32 %v484_v17, %v485_v13 }
  0xd4   : > { %v487_v20 = vmax.f32 %v486_v19, 0.0  ;;  %v488_v21 = vadd.f32 1e-05, %v483_v18 }
  0xd6   : > { %799 = vrsqrt.f32 %v488_v21  ;;  %v501_v22 = vadd.f32 1e-05, %v487_v20  ;;  %vm495_vm6 = vweird.f32 %v488_v21 }
  0xd8   : > { %801 = vrsqrt.f32 %v501_v22  ;;  %vm508_vm9 = vweird.f32 %v501_v22 }
  0xdc   : > { %v800_v23 = vpop.eup %799 }
  0xdd   : > { %v490_v24 = vmul.f32 %v800_v23, %v488_v21  ;;  %vm496_vm5 = vweird.f32 %v800_v23 }
  0xde   : > { %v802_v25 = vpop.eup %801  ;;  %vm497_vm8 = vmor %vm495_vm6, %vm496_vm5 }
  0xdf   : > { %v491_v26 = vmul.f32 %v800_v23, %v490_v24  ;;  %v503_v28 = vmul.f32 %v802_v25, %v501_v22  ;;  %vm509_vm7 = vweird.f32 %v802_v25 }
  0xe0   : > { %vm510_vm10 = vmor %vm508_vm9, %vm509_vm7 }
  0xe1   : > { %v492_v29 = vmul.f32 0.5, %v491_v26  ;;  %v504_v30 = vmul.f32 %v802_v25, %v503_v28 }
  0xe3   : > { %v493_v31 = vsub.f32 1.5, %v492_v29  ;;  %v505_v32 = vmul.f32 0.5, %v504_v30 }
  0xe5   : > { %v494_v34 = vmul.f32 %v800_v23, %v493_v31  ;;  %v506_v36 = vsub.f32 1.5, %v505_v32 }
  0xe7   : > { %v498_v38 = vsel %vm497_vm8, %v800_v23, %v494_v34  ;;  %v507_v27 = vmul.f32 %v802_v25, %v506_v36 }
  0xe8   : > { %v500_v42 = vmul.f32 %v499_v33, %v498_v38 }
  0xe9   : > { %v511_v43 = vsel %vm510_vm10, %v802_v25, %v507_v27 }
  0xea   : > { %v513_v45 = vmul.f32 %v512_v37, %v511_v43  ;;  %v514_v46 = vmul.f32 %v500_v42, %v478_v9 }
  0xec   : > { %v517_v48 = vmul.f32 %v513_v45, %v479_v10  ;;  %v521_v49 = vsel %vm1064_vm2, %v500_v42, %v513_v45  ;;  %v516_v50 = vsub.f32 %v515_v44, %v514_v46  ;;  %v522_v51 = vsel %vm1068_vm3, %v500_v42, %v513_v45 }
  0xed   : > { %v523_v52 = vsel %vm1072_vm4, %v500_v42, %v513_v45  ;;  %v532_v53 = vrot.slane %v521_v49, 7  ;;  %v520_v55 = vsel %vm1060_vm1, %v500_v42, %v513_v45  ;;  %v533_v56 = vrot.slane %v522_v51, 6 }
  0xee   : > { %v519_v54 = vsub.f32 %v518_v47, %v517_v48  ;;  %v534_v57 = vrot.slane %v523_v52, 5 }
  0xef   : > { %v535_v58 = vsel %vm338_vm0, %v520_v55, %v532_v53 }
  0xf0   : > { %v525_v59 = vsel %vm1064_vm2, %v516_v50, %v519_v54  ;;  %v526_v60 = vsel %vm1068_vm3, %v516_v50, %v519_v54  ;;  %v527_v61 = vsel %vm1072_vm4, %v516_v50, %v519_v54  ;;  %v537_v62 = vsel %vm536_vm11, %v533_v56, %v534_v57 }
  0xf1   : > { %v547_v63 = vrot.slane %v525_v59, 7  ;;  %v548_v0 = vrot.slane %v526_v60, 6  ;;  %v549_v1 = vrot.slane %v527_v61, 5  ;;  %v524_v5 = vsel %vm1060_vm1, %v516_v50, %v519_v54 }
  0xf2   : > { %v539_v6 = vsel %vm538_vm12, %v535_v58, %v537_v62 }
  0xf3   : > { %v541_v39 = vmul.f32 %v539_v6, %v1021_v2  ;;  %v542_v7 = vmul.f32 %v539_v6, %v1023_v3  ;;  %v550_v40 = vsel %vm338_vm0, %v524_v5, %v547_v63  ;;  %v551_v41 = vsel %vm536_vm11, %v548_v0, %v549_v1 }
  0xf4   : > { %v552_v8 = vsel %vm538_vm12, %v550_v40, %v551_v41  ;;  %568 = sbr.rel (!%p968_p5) target bundleno = 257 (0x101), region = 101 }
  0xf5   : > { %v554_v9 = vadd.f32 %v552_v8, %v541_v39  ;;  %v555_v10 = vadd.f32 %v552_v8, %v542_v7 }
  0xf7   : > { %560 = vst.msk [vmem:[%s317_s14] sm:$0xf] %vm558_vm13, %v554_v9 }
  0xf8   : > { %561 = vst.msk [vmem:[%s317_s14 + $0x4] sm:$0xf] %vm558_vm13, %v555_v10 }
  0xfe   : > { %v587_v2 = vld [vmem:[%s317_s14] sm:$0xf] }
  0xff   : > { %v589_v3 = vld [vmem:[%s317_s14 + $0x4] sm:$0xf]  ;;  %588 = vst [vmem:[%s570_s23] sm:$0xf] %v587_v2 }
 0x100   : > { %590 = vst [vmem:[%s570_s23 + $0x10] sm:$0xf] %v589_v3 }
 0x101 PF: > { %p15_p13 = scmp.ge.s32.totalorder %s952_s22, 6   ;;  %s1155_s18 = smov %s893_s19 }
 0x102   : > { %s1156_s19 = smov %s962_s25  ;;  %s1157_s20 = smov %s952_s22 }
 0x103   :  { %17 = sbr.rel (!%p15_p13) target bundleno = 4 (0x4), region = 174 }
 0x108   :  { %628 = vsyncpa [#allocation3], 1 }
 0x109   :  { %630 = vsyncpa [#allocation3 + $0x1], 1 }
 0x10a   :  { %631 = vsyncpa [#allocation5], 1 }
 0x10b   :  { %632 = vsyncpa [#allocation8], 1 }

</bundles_post_ra>
